<compile_context>
chip_gen: v5e
topology: v5e:2x2
jax: 0.10.0
libtpu: 0.0.40
codegen_flags: <defaults>
</compile_context>

<pallas_src>
import functools

import jax
import jax.numpy as jnp
from jax import lax
from jax.experimental import pallas as pl
from jax.experimental.pallas import tpu as pltpu

F32 = jnp.float32
BF16 = jnp.bfloat16
SELU_ALPHA = 1.6732632423543772
SELU_SCALE = 1.0507009873554805
FC_KP, FC_NP = 1024, 512          # shape bucket: every FC layer reuses one compiled kernel


def _ru(x, m):
    return (x + m - 1) // m * m


def _pick_tile(dim, cap):
    """Largest tile <= cap that divides dim (dim is a multiple of 128 when > cap)."""
    if dim <= cap:
        return dim
    t = cap - cap % 128
    while t >= 128:
        if dim % t == 0:
            return t
        t -= 128
    return 128


# --------------------------------------------------------------------------
# Pallas kernel 1: tiled bf16 matmul, f32 accumulation, fused bias + activation
# epilogue (used for every conv GEMM and every FC layer).
# --------------------------------------------------------------------------
def _matmul_kernel(a_ref, b_ref, bias_ref, o_ref, acc_ref, *, act):
    @pl.when(pl.program_id(2) == 0)
    def _():
        acc_ref[...] = jnp.zeros_like(acc_ref)

    acc_ref[...] += jnp.dot(a_ref[...], b_ref[...],
                            preferred_element_type=jnp.float32)

    @pl.when(pl.program_id(2) == pl.num_programs(2) - 1)
    def _():
        o = acc_ref[...] + bias_ref[...]
        if act == "tanh":
            o = jnp.tanh(o)
        elif act == "selu":
            o = SELU_SCALE * jnp.where(o > 0, o, SELU_ALPHA * jnp.expm1(o))
        o_ref[...] = o


@functools.lru_cache(maxsize=None)
def _get_matmul_fn(Mp, Kp, Np, act):
    if Mp <= 64:                                   # FC layers and deep 1x1/2x2/4x4 levels
        tm, tk, tn = Mp, _pick_tile(Kp, 2048), _pick_tile(Np, 512)
    else:
        tm, tk, tn = _pick_tile(Mp, 1024), _pick_tile(Kp, 1024), _pick_tile(Np, 256)
    kernel = functools.partial(_matmul_kernel, act=act)
    return pl.pallas_call(
        kernel,
        out_shape=jax.ShapeDtypeStruct((Mp, Np), F32),
        grid=(Mp // tm, Np // tn, Kp // tk),
        in_specs=[
            pl.BlockSpec((tm, tk), lambda i, j, k: (i, k)),
            pl.BlockSpec((tk, tn), lambda i, j, k: (k, j)),
            pl.BlockSpec((1, tn), lambda i, j, k: (0, j)),
        ],
        out_specs=pl.BlockSpec((tm, tn), lambda i, j, k: (i, j)),
        scratch_shapes=[pltpu.VMEM((tm, tn), F32)],
        compiler_params=pltpu.CompilerParams(
            dimension_semantics=("parallel", "parallel", "arbitrary"),
            vmem_limit_bytes=32 * 1024 * 1024),
    )


def pallas_matmul(a, b, bias=None, act=None):
    """a:(M,K), b:(K,N) -> (M,N) f32.  Operands are cast to bf16; pads only if misaligned."""
    M, K = a.shape
    _, N = b.shape
    Mp = _ru(M, 8) if M <= 1024 else _ru(M, 1024)
    Kp, Np = _ru(K, 128), _ru(N, 128)
    a = a.astype(BF16)
    b = b.astype(BF16)
    if (Mp, Kp) != (M, K):
        a = jnp.pad(a, ((0, Mp - M), (0, Kp - K)))
    if (Kp, Np) != (K, N):
        b = jnp.pad(b, ((0, Kp - K), (0, Np - N)))
    if bias is None:
        biasp = jnp.zeros((1, Np), F32)
    else:
        biasp = jnp.pad(bias.astype(F32).reshape(1, N), ((0, 0), (0, Np - N)))
    out = _get_matmul_fn(Mp, Kp, Np, act)(a, b, biasp)
    return out[:M, :N]


# --------------------------------------------------------------------------
# Pallas kernel 2: per-(b,c) spatial mean  +  optional InstanceNorm (biased var,
# eps=1e-5) + per-row scale/shift (affine + broadcast FC add) + optional leaky.
# x is a zero-padded (Rp, Lp) view of (B*C, H*W); real spatial size L is static.
# --------------------------------------------------------------------------
def _norm_mean_kernel(x_ref, s_ref, t_ref, y_ref, m_ref, *, inv_n, do_norm,
                      do_leaky, eps):
    x = x_ref[...]
    mean = jnp.sum(x, axis=1, keepdims=True) * inv_n
    m_ref[...] = jnp.broadcast_to(mean, m_ref.shape)
    if do_norm:
        var = jnp.sum(x * x, axis=1, keepdims=True) * inv_n - mean * mean
        var = jnp.maximum(var, 0.0)
        xh = (x - mean) * lax.rsqrt(var + eps)
    else:
        xh = x
    y = xh * s_ref[...] + t_ref[...]
    if do_leaky:
        y = jnp.where(y > 0, y, 0.2 * y)
    y_ref[...] = y


@functools.lru_cache(maxsize=None)
def _get_norm_mean_fn(Rp, Lp, L, rb, do_norm, do_leaky):
    kernel = functools.partial(_norm_mean_kernel, inv_n=1.0 / float(L),
                               do_norm=do_norm, do_leaky=do_leaky, eps=1e-5)
    return pl.pallas_call(
        kernel,
        out_shape=(jax.ShapeDtypeStruct((Rp, Lp), F32),
                   jax.ShapeDtypeStruct((Rp, 128), F32)),
        grid=(Rp // rb,),
        in_specs=[
            pl.BlockSpec((rb, Lp), lambda i: (i, 0)),
            pl.BlockSpec((rb, 1), lambda i: (i, 0)),
            pl.BlockSpec((rb, 1), lambda i: (i, 0)),
        ],
        out_specs=(pl.BlockSpec((rb, Lp), lambda i: (i, 0)),
                   pl.BlockSpec((rb, 128), lambda i: (i, 0))),
        compiler_params=pltpu.CompilerParams(
            dimension_semantics=("parallel",),
            vmem_limit_bytes=32 * 1024 * 1024),
    )


def _norm_rows(Lp):
    if Lp >= 8192:
        return 8          # (8, 65536) f32 block = 2 MB
    if Lp >= 1024:
        return 64
    return 256            # deep layers: big row blocks, few grid steps


@functools.partial(jax.jit, static_argnums=(3, 4))
def _norm_and_mean_jit(x4d, scale, shift, do_norm, do_leaky):
    B, C, H, W = x4d.shape
    R, L = B * C, H * W
    Lp = _ru(L, 128)
    rb = _norm_rows(Lp)
    Rp = _ru(R, rb)
    x2 = x4d.reshape(R, L).astype(F32)
    if (Rp, Lp) != (R, L):
        x2 = jnp.pad(x2, ((0, Rp - R), (0, Lp - L)))
    s = scale.astype(F32).reshape(R, 1)
    t = shift.astype(F32).reshape(R, 1)
    if Rp != R:
        s = jnp.pad(s, ((0, Rp - R), (0, 0)))
        t = jnp.pad(t, ((0, Rp - R), (0, 0)))
    y, m = _get_norm_mean_fn(Rp, Lp, L, rb, do_norm, do_leaky)(x2, s, t)
    return y[:R, :L].reshape(B, C, H, W), m[:R, 0].reshape(B, C)


def norm_and_mean(x4d, scale, shift, do_norm, do_leaky):
    """Returns (y, mean) where mean = mymean(x) and
    y = [instance_norm(x)] * scale + shift  (+ optional leaky_relu)."""
    B, C = x4d.shape[0], x4d.shape[1]
    R = B * C
    if scale is None:
        scale = jnp.ones(R, F32)
    if shift is None:
        shift = jnp.zeros(R, F32)
    return _norm_and_mean_jit(x4d, scale, shift, bool(do_norm), bool(do_leaky))


# --------------------------------------------------------------------------
# Conv / FC wrappers (NHWC bf16 im2col + Pallas GEMM), jitted per static config.
# --------------------------------------------------------------------------
@functools.partial(jax.jit, static_argnums=(3, 4, 5, 6, 7, 8, 9))
def _conv2d_jit(x, wmat, bias, stride, pad, kh, kw, leaky_in, act, up2):
    # pad = (top, bottom, left, right); zero padding commutes with leaky (leaky(0)=0).
    if leaky_in:
        x = jnp.where(x > 0, x, 0.2 * x)
    if up2:                                          # nearest 2x upsample (Deconv_des19)
        x = jnp.repeat(jnp.repeat(x, 2, axis=2), 2, axis=3)
    B, C, H, W = x.shape
    Kp, Cout = wmat.shape
    xp = jnp.pad(x, ((0, 0), (0, 0), (pad[0], pad[1]), (pad[2], pad[3])))
    xp = jnp.transpose(xp, (0, 2, 3, 1)).astype(BF16)        # NHWC, bf16
    Hp, Wp = xp.shape[1], xp.shape[2]
    oh = (Hp - kh) // stride + 1
    ow = (Wp - kw) // stride + 1
    taps = []
    for dy in range(kh):
        for dx in range(kw):
            taps.append(xp[:, dy:dy + stride * (oh - 1) + 1:stride,
                              dx:dx + stride * (ow - 1) + 1:stride, :])
    K = kh * kw * C
    if Kp > K:                                       # K-pad fused into the single concat
        taps.append(jnp.zeros((B, oh, ow, Kp - K), BF16))
    patches = jnp.concatenate(taps, axis=-1).reshape(B * oh * ow, Kp)
    out = pallas_matmul(patches, wmat, bias=bias, act=act)
    return out.reshape(B, oh, ow, Cout).transpose(0, 3, 1, 2)


def conv2d(x, wmat, k, bias=None, stride=1, pad=(1, 1, 1, 1), leaky_in=False,
           act=None, up2=False):
    return _conv2d_jit(x, wmat, bias, stride, pad, k, k, leaky_in, act, up2)


def deconv_des19(x, w1, w2, leaky_in):
    out = conv2d(x, w1, 4, stride=1, pad=(1, 2, 1, 2), leaky_in=leaky_in, up2=True)
    return conv2d(out, w2, 4, stride=1, pad=(1, 2, 1, 2))


@functools.partial(jax.jit, static_argnums=(3, 4))
def _fc_core(x2, wm, bias, cout, act):
    Cin = x2.shape[1]
    a = jnp.pad(x2.astype(BF16), ((0, 0), (0, FC_KP - Cin)))
    out = pallas_matmul(a, wm, bias=bias, act=act)
    return out[:, :cout]


def fc(x2, p, act=None):
    return _fc_core(x2, p['w'], p['b'], p['cout'], act)


# --------------------------------------------------------------------------
# Parameter init (deterministic, synthetic) with GEMM-ready weight layouts.
# --------------------------------------------------------------------------
def prep_conv_w(w):
    """(Cout, Cin, kh, kw) -> (Kp, Cout) bf16 with K order ((dy*kw+dx)*Cin + c)."""
    Cout, Cin, kh, kw = w.shape
    K = kh * kw * Cin
    Kp = _ru(K, 128)
    wm = jnp.transpose(w, (2, 3, 1, 0)).reshape(K, Cout)
    if Kp != K:
        wm = jnp.pad(wm, ((0, Kp - K), (0, 0)))
    return wm.astype(BF16)


def prep_fc(w, b=None):
    """(Cout, Cin) -> bucketed (FC_KP, FC_NP) bf16 weight + (FC_NP,) f32 bias."""
    Cout, Cin = w.shape
    wm = jnp.zeros((FC_KP, FC_NP), BF16).at[:Cin, :Cout].set(w.T.astype(BF16))
    bias = jnp.zeros((FC_NP,), F32)
    if b is not None:
        bias = bias.at[:Cout].set(b.astype(F32))
    return {'w': wm, 'b': bias, 'cout': Cout}


def init_params(key):
    kit = iter(jax.random.split(key, 200))

    def conv_w(cout, cin, k):
        w = jax.random.normal(next(kit), (cout, cin, k, k), F32) * (float(cin * k * k) ** -0.5)
        return prep_conv_w(w)

    def fc_p(cout, cin, bias):
        w = jax.random.normal(next(kit), (cout, cin), F32) * (float(cin) ** -0.5)
        b = jax.random.normal(next(kit), (cout,), F32) * 0.01 if bias else None
        return prep_fc(w, b)

    P = {}
    enc_io = [(5, 64), (64, 128), (128, 256), (256, 512),
              (512, 512), (512, 512), (512, 512), (512, 512)]
    P['enc'] = [conv_w(o, ci, 4) for ci, o in enc_io]

    dec_io = {8: (512, 512), 7: (1024, 512), 6: (1024, 512), 5: (1024, 512),
              4: (1024, 256), 3: (512, 128), 2: (256, 64), 1: (128, 64)}
    P['dec'] = {l: {'w1': conv_w(o, ci, 4), 'w2': conv_w(o, o, 4)}
                for l, (ci, o) in dec_io.items()}

    P['in_en'] = {l: (jnp.ones(c, F32), jnp.zeros(c, F32))
                  for l, c in {2: 128, 3: 256, 4: 512, 5: 512, 6: 512, 7: 512}.items()}
    P['in_de'] = {l: (jnp.ones(c, F32), jnp.zeros(c, F32))
                  for l, c in {8: 512, 7: 512, 6: 512, 5: 512, 4: 256, 3: 128, 2: 64}.items()}

    gfc_io = {1: (5, 128), 2: (256, 256), 3: (512, 512), 4: (1024, 512),
              5: (1024, 512), 6: (1024, 512), 7: (1024, 512), 8: (1024, 512)}
    P['gfc'] = {l: fc_p(o, ci, True) for l, (ci, o) in gfc_io.items()}

    P['gtl'] = {l: fc_p(c, c, False)
                for l, c in {2: 128, 3: 256, 4: 512, 5: 512, 6: 512, 7: 512, 8: 512}.items()}

    gdfc_io = {8: (1024, 512), 7: (1024, 512), 6: (1024, 512), 5: (1024, 512),
               4: (768, 256), 3: (384, 128), 2: (192, 64), 1: (128, 64)}
    P['gdfc'] = {l: fc_p(o, ci, True) for l, (ci, o) in gdfc_io.items()}

    gtld_io = {8: (512, 512), 7: (512, 512), 6: (512, 512), 5: (512, 512),
               4: (512, 256), 3: (256, 128), 2: (128, 64), 1: (64, 64)}
    P['gtld'] = {l: fc_p(o, ci, False) for l, (ci, o) in gtld_io.items()}

    P['lastconv1'] = conv_w(64, 64, 3)
    P['lastconv2'] = conv_w(32, 64, 3)
    P['lastconv3_w'] = conv_w(9, 32, 3)
    P['lastconv3_b'] = jax.random.normal(next(kit), (9,), F32) * 0.01
    P['lastin1'] = (jnp.ones(64, F32), jnp.zeros(64, F32))
    P['lastin2'] = (jnp.ones(32, F32), jnp.zeros(32, F32))
    P['lastg'] = {0: fc_p(64, 128, True), 1: fc_p(32, 128, True), 2: fc_p(9, 64, True)}
    P['lastgtl'] = {0: fc_p(64, 64, False), 1: fc_p(64, 64, False), 2: fc_p(32, 32, False)}
    return P


# --------------------------------------------------------------------------
# Forward pass of Net_Des19
# --------------------------------------------------------------------------
def net_forward(params, x, no_input=1):
    B = x.shape[0]
    enc_list, G = [], []

    # ---------------- encoder ----------------
    for i in range(8):
        w = params['enc'][i]
        if i == 0:
            enc = conv2d(x, w, 4, stride=2, pad=(1, 1, 1, 1))
            _, mean_in = norm_and_mean(x, None, None, False, False)     # mymean(input)
            g = fc(mean_in, params['gfc'][1], act='selu')
            enc_list.append(enc)
            G.append(g)
        else:
            enc_raw = conv2d(enc_list[-1], w, 4, stride=2, pad=(1, 1, 1, 1), leaky_in=True)
            C = enc_raw.shape[1]
            gtl = fc(G[-1], params['gtl'][i + 1])
            if i < 7:
                iw, ib = params['in_en'][i + 1]
                enc_new, mean_raw = norm_and_mean(
                    enc_raw, jnp.tile(iw, B), jnp.tile(ib, B) + gtl.reshape(B * C),
                    True, False)
            else:
                enc_new, mean_raw = norm_and_mean(
                    enc_raw, jnp.ones(B * C, F32), gtl.reshape(B * C), False, False)
            g = fc(jnp.concatenate([G[-1], mean_raw], axis=1),
                   params['gfc'][i + 1], act='selu')
            enc_list.append(enc_new)
            G.append(g)

    # ---------------- decoder ----------------
    D, Gd = [], []
    for i in range(8):
        lvl = 8 - i
        dp = params['dec'][lvl]
        src = enc_list[-1] if i == 0 else D[-1]
        dec_raw = deconv_des19(src, dp['w1'], dp['w2'], leaky_in=True)
        prev_g = G[-1] if i == 0 else Gd[-1]
        gtl = fc(prev_g, params['gtld'][lvl])
        C = dec_raw.shape[1]
        if i < 7:
            iw, ib = params['in_de'][lvl]
            dec_new, mean_raw = norm_and_mean(
                dec_raw, jnp.tile(iw, B), jnp.tile(ib, B) + gtl.reshape(B * C),
                True, False)
        else:
            dec_new, mean_raw = norm_and_mean(
                dec_raw, jnp.ones(B * C, F32), gtl.reshape(B * C), False, False)
        gd = fc(jnp.concatenate([prev_g, mean_raw], axis=1),
                params['gdfc'][lvl], act='selu')
        if i < 7:
            dec_new = jnp.concatenate([dec_new, enc_list[6 - i]], axis=1)
        D.append(dec_new)
        Gd.append(gd)

    # ---------------- max over the input group ----------------
    if D[-1].shape[0] != no_input:
        local = D[-1].reshape(-1, no_input, *D[-1].shape[1:])
        maxlatent = jnp.max(local, axis=1)
        glocal = Gd[-1].reshape(-1, no_input, Gd[-1].shape[1])
        maxlatent_global = jnp.max(glocal, axis=1)
    else:
        maxlatent = jnp.max(D[-1], axis=0, keepdims=True)
        maxlatent_global = jnp.max(Gd[-1], axis=0, keepdims=True)
    Bm = maxlatent.shape[0]

    # ---------------- last block ----------------
    # i == 0
    gtl0 = fc(maxlatent_global, params['lastgtl'][0])
    C0 = maxlatent.shape[1]
    lc0, mean0 = norm_and_mean(maxlatent, jnp.ones(Bm * C0, F32),
                               gtl0.reshape(Bm * C0), False, False)
    lg0 = fc(jnp.concatenate([maxlatent_global, mean0], axis=1),
             params['lastg'][0], act='selu')
    # i == 1
    c1 = conv2d(lc0, params['lastconv1'], 3, stride=1, pad=(1, 1, 1, 1))
    gtl1 = fc(lg0, params['lastgtl'][1])
    iw, ib = params['lastin1']
    C1 = c1.shape[1]
    lc1, mean1 = norm_and_mean(c1, jnp.tile(iw, Bm),
                               jnp.tile(ib, Bm) + gtl1.reshape(Bm * C1), True, True)
    lg1 = fc(jnp.concatenate([lg0, mean1], axis=1),
             params['lastg'][1], act='selu')
    # i == 2
    c2 = conv2d(lc1, params['lastconv2'], 3, stride=1, pad=(1, 1, 1, 1))
    gtl2 = fc(lg1, params['lastgtl'][2])
    iw, ib = params['lastin2']
    C2 = c2.shape[1]
    lc2, _ = norm_and_mean(c2, jnp.tile(iw, Bm),
                           jnp.tile(ib, Bm) + gtl2.reshape(Bm * C2), True, True)
    # NOTE: the reference also computes lastglobal_fc2 here, but its result is never used.
    # i == 3
    out = conv2d(lc2, params['lastconv3_w'], 3, bias=params['lastconv3_b'],
                 stride=1, pad=(1, 1, 1, 1), act='tanh')
    return out


if __name__ == "__main__":
    # Spatial size must be 256: the 8 stride-2 encoders reduce it to 1x1 (smaller inputs
    # are invalid for the reference PyTorch module).  Batch = NoInput = 1 keeps it minimal.
    key = jax.random.PRNGKey(0)
    pkey, xkey = jax.random.split(key)
    params = init_params(pkey)
    x = jax.random.normal(xkey, (1, 5, 256, 256), F32)

    out = net_forward(params, x, no_input=1)
    out = jax.block_until_ready(out)

    assert out.shape == (1, 9, 256, 256), out.shape
    assert bool(jnp.all(jnp.isfinite(out)))
    print("KERNEL_OK")
</pallas_src>

<mosaic_0001>
module attributes {stable_mosaic.version = 11 : i64} {
  func.func @_matmul_kernel(%arg0: i32, %arg1: i32, %arg2: i32, %arg3: memref<1024x128xbf16, #tpu.memory_space<vmem>>, %arg4: memref<128x128xbf16, #tpu.memory_space<vmem>>, %arg5: memref<1x128xf32, #tpu.memory_space<vmem>>, %arg6: memref<1024x128xf32, #tpu.memory_space<vmem>>, %arg7: memref<1024x128xf32, #tpu.memory_space<vmem>>) attributes {dimension_semantics = [#tpu.dimension_semantics<parallel>, #tpu.dimension_semantics<parallel>, #tpu.dimension_semantics<arbitrary>], iteration_bounds = array<i64: 16, 1, 1>, scalar_prefetch = 0 : i64, scratch_operands = 1 : i64, tpu.core_type = #tpu.core_type<tc>, window_params = [{transform_indices = @transform_0, window_bounds = array<i64: 1024, 128>}, {transform_indices = @transform_1, window_bounds = array<i64: 128, 128>}, {transform_indices = @transform_2, window_bounds = array<i64: 1, 128>}, {transform_indices = @transform_3, window_bounds = array<i64: 1024, 128>}]} {
    %c0_i32 = arith.constant 0 : i32
    %0 = arith.cmpi eq, %arg2, %c0_i32 : i32
    %1 = arith.extui %0 : i1 to i32
    %c0_i32_0 = arith.constant 0 : i32
    %2 = arith.cmpi ne, %1, %c0_i32_0 : i32
    scf.if %2 {
      %cst_10 = arith.constant 0.000000e+00 : f32
      %12 = vector.broadcast %cst_10 : f32 to vector<1024x128xf32>
      %c0_11 = arith.constant 0 : index
      %c0_12 = arith.constant 0 : index
      %13 = vector.load %arg7[%c0_11, %c0_12] : memref<1024x128xf32, #tpu.memory_space<vmem>>, vector<1024x128xf32>
      tpu.vector_store %arg7[%c0_11, %c0_12], %12 {strides = array<i32>} : memref<1024x128xf32, #tpu.memory_space<vmem>>, vector<1024x128xf32>,
    } else {
    }
    %c0 = arith.constant 0 : index
    %c0_1 = arith.constant 0 : index
    %3 = vector.load %arg7[%c0, %c0_1] : memref<1024x128xf32, #tpu.memory_space<vmem>>, vector<1024x128xf32>
    %c0_2 = arith.constant 0 : index
    %c0_3 = arith.constant 0 : index
    %4 = vector.load %arg3[%c0_2, %c0_3] : memref<1024x128xbf16, #tpu.memory_space<vmem>>, vector<1024x128xbf16>
    %c0_4 = arith.constant 0 : index
    %c0_5 = arith.constant 0 : index
    %5 = vector.load %arg4[%c0_4, %c0_5] : memref<128x128xbf16, #tpu.memory_space<vmem>>, vector<128x128xbf16>
    %cst = arith.constant dense<0.000000e+00> : vector<1024x128xf32>
    %6 = tpu.matmul %4, %5, %cst {dimension_numbers = #tpu.dot_dimension_numbers<[1], [0], [0], [1], [0, 0, 1, 1], [], []>} : vector<1024x128xbf16>, vector<128x128xbf16>, vector<1024x128xf32> -> vector<1024x128xf32>
    %7 = arith.addf %3, %6 : vector<1024x128xf32>
    %c0_6 = arith.constant 0 : index
    %c0_7 = arith.constant 0 : index
    %8 = vector.load %arg7[%c0_6, %c0_7] : memref<1024x128xf32, #tpu.memory_space<vmem>>, vector<1024x128xf32>
    tpu.vector_store %arg7[%c0_6, %c0_7], %7 {strides = array<i32>} : memref<1024x128xf32, #tpu.memory_space<vmem>>, vector<1024x128xf32>,
    %c0_i32_8 = arith.constant 0 : i32
    %9 = arith.cmpi eq, %arg2, %c0_i32_8 : i32
    %10 = arith.extui %9 : i1 to i32
    %c0_i32_9 = arith.constant 0 : i32
    %11 = arith.cmpi ne, %10, %c0_i32_9 : i32
    scf.if %11 {
      %c0_10 = arith.constant 0 : index
      %c0_11 = arith.constant 0 : index
      %12 = vector.load %arg7[%c0_10, %c0_11] : memref<1024x128xf32, #tpu.memory_space<vmem>>, vector<1024x128xf32>
      %c0_12 = arith.constant 0 : index
      %c0_13 = arith.constant 0 : index
      %13 = vector.load %arg5[%c0_12, %c0_13] : memref<1x128xf32, #tpu.memory_space<vmem>>, vector<1x128xf32>
      %14 = vector.broadcast %13 : vector<1x128xf32> to vector<1024x128xf32>
      %15 = arith.addf %12, %14 : vector<1024x128xf32>
      %c0_14 = arith.constant 0 : index
      %c0_15 = arith.constant 0 : index
      %16 = vector.load %arg6[%c0_14, %c0_15] : memref<1024x128xf32, #tpu.memory_space<vmem>>, vector<1024x128xf32>
      tpu.vector_store %arg6[%c0_14, %c0_15], %15 {strides = array<i32>} : memref<1024x128xf32, #tpu.memory_space<vmem>>, vector<1024x128xf32>,
    } else {
    }
    return
  }
  func.func @transform_0(%arg0: i32, %arg1: i32, %arg2: i32) -> (i32, i32) {
    %c0_i32 = arith.constant 0 : i32
    return %arg0, %arg2 : i32, i32
  }
  func.func @transform_1(%arg0: i32, %arg1: i32, %arg2: i32) -> (i32, i32) {
    %c0_i32 = arith.constant 0 : i32
    return %arg2, %arg1 : i32, i32
  }
  func.func @transform_2(%arg0: i32, %arg1: i32, %arg2: i32) -> (i32, i32) {
    %c0_i32 = arith.constant 0 : i32
    %c0_i32_0 = arith.constant 0 : i32
    return %c0_i32, %arg1 : i32, i32
  }
  func.func @transform_3(%arg0: i32, %arg1: i32, %arg2: i32) -> (i32, i32) {
    %c0_i32 = arith.constant 0 : i32
    return %arg0, %arg1 : i32, i32
  }
}

</mosaic_0001>

<bundles_post_ra>
// kernel: _conv2d_jit.1
= control target key start
LH: loop header
LB: loop body
LE: loop exit
PB: predicated region body
PF: predicated region fallthrough
CT: control target
= control target key end

     0   :  { %s2648_s12 = smov 0   ;;  %s2650_s13 = smov 0   ;;  %s3041_s0 = inlined_call_operand.vmem [shape: bf16[16384,128], index: 0, kind: input, shape index: {}]   ;;  %s3042_s1 = inlined_call_operand.vmem [shape: bf16[128,128], index: 1, kind: input, shape index: {}]   ;;  %s3043_s2 = inlined_call_operand.vmem [shape: f32[1,128], index: 2, kind: input, shape index: {}]   ;;  %s3044_s3 = inlined_call_operand.vmem [shape: f32[16384,128], index: 3, kind: output, shape index: {}]  }
   0x1   :  { %s2652_s14 = smov 0  }
   0x2 LB: > { %s32_s15 = sadd.s32 1, %s2622_s13  ;;  %p2188_p0 = scmp.ge.s32.totalorder %s2626_s14, 1  ;;  %s2626_s14 = sphi %s2652_s14, %s13_s14   ;;  %s2622_s13 = sphi %s2650_s13, %s3046_s13   ;;  %s2618_s12 = sphi %s2648_s12, %s3045_s12  }
   0x3   : > { %p34_p1 = scmp.ge.s32.totalorder %s32_s15, 16  ;;  %p188_p2 = scmp.lt.s32.totalorder %s2626_s14, 17 }
   0x5   : > { %s3048_s15 = smov (%p34_p1, %s32_s15), 0  ;;  %p189_p3 = pnand %p2188_p0, %p188_p2 }
   0x6   : > { %s2189_s24 = sshll.u32 (!%p189_p3), %s2618_s12, 7 }
   0x7   : > { %192 = sbr.rel (%p189_p3) target bundleno = 429 (0x1ad), region = 32  ;;  %p230_p4 = scmp.lt.s32.totalorder (!%p189_p3), %s2189_s24, 2047 }
   0xc   : > { %v2554_v0 = vld [vmem:[%s3042_s1 + $0x38] sm:$0xff]  ;;  %v2553_v1 = vld [vmem:[%s3042_s1 + $0x30] sm:$0xff]  ;;  %v2552_v2 = vld [vmem:[%s3042_s1 + $0x28] sm:$0xff]  ;;  %s3050_s24 = smov (!%p230_p4, %s2189_s24), 2047 }
   0xd   : > { %1095 = vmatpush.bf16.msra.mxu0 %v2554_v0  ;;  %2555 = vmatpush.bf16.msra.mxu1 %v2554_v0  ;;  %v2551_v3 = vld [vmem:[%s3042_s1 + $0x20] sm:$0xff]  ;;  %v2550_v4 = vld [vmem:[%s3042_s1 + $0x18] sm:$0xff]  ;;  %v2549_v5 = vld [vmem:[%s3042_s1 + $0x10] sm:$0xff]  ;;  %s2190_s4 = sshll.u32 %s3050_s24, 2  ;;  %s2192_s10 = sshll.u32 %s3050_s24, 3 }
   0xe   : > { %2556 = vmatpush.bf16.msra.mxu2 %v2554_v0  ;;  %2557 = vmatpush.bf16.msra.mxu3 %v2554_v0  ;;  %v2548_v6 = vld [vmem:[%s3042_s1 + $0x8] sm:$0xff]  ;;  %v2547_v7 = vld [vmem:[%s3042_s1] sm:$0xff]  ;;  %s2699_s9 = scalar_lea.vmem %s3041_s0, %s2190_s4  ;;  %s2744_s18 = scalar_lea.vmem %s3044_s3, %s2192_s10 }
   0xf   : > { %v2483_v8 = vld [vmem:[%s2699_s9] sm:$0xff]  ;;  %v2484_v12 = vld [vmem:[%s2699_s9 + $0x8] sm:$0xff]  ;;  %v2485_v16 = vld [vmem:[%s2699_s9 + $0x10] sm:$0xff] }
  0x10   : > { %v2499_v9 = vld [vmem:[%s2699_s9 + $0x80] sm:$0xff]  ;;  %v2500_v13 = vld [vmem:[%s2699_s9 + $0x88] sm:$0xff]  ;;  %v2501_v17 = vld [vmem:[%s2699_s9 + $0x90] sm:$0xff] }
  0x11   : > { %1096 = vmatpush.bf16.msra.mxu0 %v2553_v1  ;;  %2558 = vmatpush.bf16.msra.mxu1 %v2553_v1  ;;  %v2515_v10 = vld [vmem:[%s2699_s9 + $0x100] sm:$0xff]  ;;  %v2516_v14 = vld [vmem:[%s2699_s9 + $0x108] sm:$0xff]  ;;  %v2517_v18 = vld [vmem:[%s2699_s9 + $0x110] sm:$0xff] }
  0x12   : > { %2559 = vmatpush.bf16.msra.mxu2 %v2553_v1  ;;  %2560 = vmatpush.bf16.msra.mxu3 %v2553_v1  ;;  %v2531_v11 = vld [vmem:[%s2699_s9 + $0x180] sm:$0xff]  ;;  %v2532_v15 = vld [vmem:[%s2699_s9 + $0x188] sm:$0xff]  ;;  %v2533_v19 = vld [vmem:[%s2699_s9 + $0x190] sm:$0xff] }
  0x13   : > { %v2486_v20 = vld [vmem:[%s2699_s9 + $0x18] sm:$0xff]  ;;  %v2487_v24 = vld [vmem:[%s2699_s9 + $0x20] sm:$0xff]  ;;  %v2488_v28 = vld [vmem:[%s2699_s9 + $0x28] sm:$0xff] }
  0x14   : > { %v2502_v21 = vld [vmem:[%s2699_s9 + $0x98] sm:$0xff]  ;;  %v2503_v25 = vld [vmem:[%s2699_s9 + $0xa0] sm:$0xff]  ;;  %v2504_v29 = vld [vmem:[%s2699_s9 + $0xa8] sm:$0xff] }
  0x15   : > { %1097 = vmatpush.bf16.msra.mxu0 %v2552_v2  ;;  %2561 = vmatpush.bf16.msra.mxu1 %v2552_v2  ;;  %v2518_v22 = vld [vmem:[%s2699_s9 + $0x118] sm:$0xff]  ;;  %v2519_v26 = vld [vmem:[%s2699_s9 + $0x120] sm:$0xff]  ;;  %v2520_v30 = vld [vmem:[%s2699_s9 + $0x128] sm:$0xff] }
  0x16   : > { %2562 = vmatpush.bf16.msra.mxu2 %v2552_v2  ;;  %2563 = vmatpush.bf16.msra.mxu3 %v2552_v2  ;;  %v2534_v23 = vld [vmem:[%s2699_s9 + $0x198] sm:$0xff]  ;;  %v2535_v27 = vld [vmem:[%s2699_s9 + $0x1a0] sm:$0xff]  ;;  %v2536_v31 = vld [vmem:[%s2699_s9 + $0x1a8] sm:$0xff] }
  0x17   : > { %v2489_v32 = vld [vmem:[%s2699_s9 + $0x30] sm:$0xff]  ;;  %v2490_v36 = vld [vmem:[%s2699_s9 + $0x38] sm:$0xff]  ;;  %v2737_v40 = vld [vmem:[%s3043_s2] ss:$0 sm:$0xff] }
  0x18   : > { %v2505_v33 = vld [vmem:[%s2699_s9 + $0xb0] sm:$0xff]  ;;  %v2506_v37 = vld [vmem:[%s2699_s9 + $0xb8] sm:$0xff]  ;;  %v2491_v41 = vld [vmem:[%s2699_s9 + $0x40] sm:$0xff] }
  0x19   : > { %1098 = vmatpush.bf16.msra.mxu0 %v2551_v3  ;;  %2564 = vmatpush.bf16.msra.mxu1 %v2551_v3  ;;  %v2521_v34 = vld [vmem:[%s2699_s9 + $0x130] sm:$0xff]  ;;  %v2522_v38 = vld [vmem:[%s2699_s9 + $0x138] sm:$0xff]  ;;  %v2507_v42 = vld [vmem:[%s2699_s9 + $0xc0] sm:$0xff] }
  0x1a   : > { %2565 = vmatpush.bf16.msra.mxu2 %v2551_v3  ;;  %2566 = vmatpush.bf16.msra.mxu3 %v2551_v3  ;;  %v2537_v35 = vld [vmem:[%s2699_s9 + $0x1b0] sm:$0xff]  ;;  %v2538_v39 = vld [vmem:[%s2699_s9 + $0x1b8] sm:$0xff]  ;;  %v2523_v45 = vld [vmem:[%s2699_s9 + $0x140] sm:$0xff] }
  0x1b   : > { %v2539_v46 = vld [vmem:[%s2699_s9 + $0x1c0] sm:$0xff]  ;;  %v2492_v59 = vld [vmem:[%s2699_s9 + $0x48] sm:$0xff] }
  0x1c   : > { %v2508_v60 = vld [vmem:[%s2699_s9 + $0xc8] sm:$0xff] }
  0x1d   : > { %1099 = vmatpush.bf16.msra.mxu0 %v2550_v4  ;;  %2567 = vmatpush.bf16.msra.mxu1 %v2550_v4  ;;  %v2524_v1 = vld [vmem:[%s2699_s9 + $0x148] sm:$0xff] }
  0x1e   : > { %2568 = vmatpush.bf16.msra.mxu2 %v2550_v4  ;;  %2569 = vmatpush.bf16.msra.mxu3 %v2550_v4  ;;  %v2540_v2 = vld [vmem:[%s2699_s9 + $0x1c8] sm:$0xff] }
  0x21   : > { %1100 = vmatpush.bf16.msra.mxu0 %v2549_v5  ;;  %2570 = vmatpush.bf16.msra.mxu1 %v2549_v5 }
  0x22   : > { %2571 = vmatpush.bf16.msra.mxu2 %v2549_v5  ;;  %2572 = vmatpush.bf16.msra.mxu3 %v2549_v5 }
  0x25   : > { %1101 = vmatpush.bf16.msra.mxu0 %v2548_v6  ;;  %2573 = vmatpush.bf16.msra.mxu1 %v2548_v6 }
  0x26   : > { %2574 = vmatpush.bf16.msra.mxu2 %v2548_v6  ;;  %2575 = vmatpush.bf16.msra.mxu3 %v2548_v6 }
  0x29   : > { %1102 = vmatpush.bf16.msra.mxu0 %v2547_v7  ;;  %2576 = vmatpush.bf16.msra.mxu1 %v2547_v7 }
  0x2a   : > { %2577 = vmatpush.bf16.msra.mxu2 %v2547_v7  ;;  %2578 = vmatpush.bf16.msra.mxu3 %v2547_v7 }
  0x2c   : > { %1103 = vmatmul.bf16.vlgmr.msra.gmra.mxu0 %v2483_v8  ;;  %1183 = vmatmul.bf16.vlgmr.msra.gmra.mxu1 %v2499_v9 }
  0x2d   : > { %1263 = vmatmul.bf16.vlgmr.msra.gmra.mxu2 %v2515_v10  ;;  %1343 = vmatmul.bf16.vlgmr.msra.gmra.mxu3 %v2531_v11 }
  0x3c   : > { %1108 = vmatmul.bf16.gmra.mxu0 %v2484_v12  ;;  %1188 = vmatmul.bf16.gmra.mxu1 %v2500_v13 }
  0x3d   : > { %1268 = vmatmul.bf16.gmra.mxu2 %v2516_v14  ;;  %1348 = vmatmul.bf16.gmra.mxu3 %v2532_v15  ;;  %v2493_v15 = vld [vmem:[%s2699_s9 + $0x50] sm:$0xff] }
  0x4c   : > { %1113 = vmatmul.bf16.gmra.mxu0 %v2485_v16  ;;  %1193 = vmatmul.bf16.gmra.mxu1 %v2501_v17  ;;  %v2509_v16 = vld [vmem:[%s2699_s9 + $0xd0] sm:$0xff] }
  0x4d   : > { %1273 = vmatmul.bf16.gmra.mxu2 %v2517_v18  ;;  %1353 = vmatmul.bf16.gmra.mxu3 %v2533_v19 }
  0x5c   : > { %1118 = vmatmul.bf16.gmra.mxu0 %v2486_v20  ;;  %1198 = vmatmul.bf16.gmra.mxu1 %v2502_v21  ;;  %v2525_v21 = vld [vmem:[%s2699_s9 + $0x150] sm:$0xff] }
  0x5d   : > { %1278 = vmatmul.bf16.gmra.mxu2 %v2518_v22  ;;  %1358 = vmatmul.bf16.gmra.mxu3 %v2534_v23  ;;  %v2541_v22 = vld [vmem:[%s2699_s9 + $0x1d0] sm:$0xff] }
  0x6c   : > { %1123 = vmatmul.bf16.gmra.mxu0 %v2487_v24  ;;  %1203 = vmatmul.bf16.gmra.mxu1 %v2503_v25 }
  0x6d   : > { %1283 = vmatmul.bf16.gmra.mxu2 %v2519_v26  ;;  %1363 = vmatmul.bf16.gmra.mxu3 %v2535_v27 }
  0x7c   : > { %1128 = vmatmul.bf16.gmra.mxu0 %v2488_v28  ;;  %1208 = vmatmul.bf16.gmra.mxu1 %v2504_v29 }
  0x7d   : > { %1288 = vmatmul.bf16.gmra.mxu2 %v2520_v30  ;;  %1368 = vmatmul.bf16.gmra.mxu3 %v2536_v31 }
  0x8c   : > { %1133 = vmatmul.bf16.gmra.mxu0 %v2489_v32  ;;  %1213 = vmatmul.bf16.gmra.mxu1 %v2505_v33 }
  0x8d   : > { %1293 = vmatmul.bf16.gmra.mxu2 %v2521_v34  ;;  %1373 = vmatmul.bf16.gmra.mxu3 %v2537_v35  ;;  %v2494_v35 = vld [vmem:[%s2699_s9 + $0x58] sm:$0xff] }
  0x9c   : > { %1138 = vmatmul.bf16.gmra.mxu0 %v2490_v36  ;;  %1218 = vmatmul.bf16.gmra.mxu1 %v2506_v37  ;;  %v2510_v36 = vld [vmem:[%s2699_s9 + $0xd8] sm:$0xff] }
  0x9d   : > { %1298 = vmatmul.bf16.gmra.mxu2 %v2522_v38  ;;  %1378 = vmatmul.bf16.gmra.mxu3 %v2538_v39 }
  0xa9   : > { %v1104_v43 = vpop.f32.mrf.mxu0  ;;  %v1184_v44 = vpop.f32.mrf.mxu1 }
  0xaa   : > { %v1815_v47 = vadd.f32 %v2737_v40, %v1104_v43  ;;  %v1847_v48 = vadd.f32 %v2737_v40, %v1184_v44  ;;  %v2542_v43 = vld [vmem:[%s2699_s9 + $0x1d8] sm:$0xff] }
  0xac   : > { %1943 = vst [vmem:[%s2744_s18] sm:$0xff] %v1815_v47  ;;  %1143 = vmatmul.bf16.gmra.mxu0 %v2491_v41  ;;  %1223 = vmatmul.bf16.gmra.mxu1 %v2507_v42  ;;  %v2526_v42 = vld [vmem:[%s2699_s9 + $0x158] sm:$0xff] }
  0xad   : > { %1975 = vst [vmem:[%s2744_s18 + $0x100] sm:$0xff] %v1847_v48  ;;  %1303 = vmatmul.bf16.gmra.mxu2 %v2523_v45  ;;  %1383 = vmatmul.bf16.gmra.mxu3 %v2539_v46 }
  0xb0   : > { %v1264_v49 = vpop.f32.mrf.mxu2  ;;  %v1344_v50 = vpop.f32.mrf.mxu3 }
  0xb1   : > { %v1879_v51 = vadd.f32 %v2737_v40, %v1264_v49  ;;  %v1911_v52 = vadd.f32 %v2737_v40, %v1344_v50  ;;  %v1106_v53 = vpop.f32.mrf.mxu0  ;;  %v1186_v54 = vpop.f32.mrf.mxu1 }
  0xb2   : > { %v1816_v55 = vadd.f32 %v2737_v40, %v1106_v53  ;;  %v1848_v56 = vadd.f32 %v2737_v40, %v1186_v54 }
  0xb3   : > { %2007 = vst [vmem:[%s2744_s18 + $0x200] sm:$0xff] %v1879_v51 }
  0xb4   : > { %2039 = vst [vmem:[%s2744_s18 + $0x300] sm:$0xff] %v1911_v52 }
  0xb5   : > { %1944 = vst [vmem:[%s2744_s18 + $0x8] sm:$0xff] %v1816_v55 }
  0xb6   : > { %1976 = vst [vmem:[%s2744_s18 + $0x108] sm:$0xff] %v1848_v56  ;;  %v2495_v56 = vld [vmem:[%s2699_s9 + $0x60] sm:$0xff] }
  0xb8   : > { %v1266_v57 = vpop.f32.mrf.mxu2  ;;  %v1346_v58 = vpop.f32.mrf.mxu3 }
  0xb9   : > { %v1880_v61 = vadd.f32 %v2737_v40, %v1266_v57  ;;  %v1912_v62 = vadd.f32 %v2737_v40, %v1346_v58  ;;  %v1109_v63 = vpop.f32.mrf.mxu0  ;;  %v1189_v0 = vpop.f32.mrf.mxu1  ;;  %v2511_v57 = vld [vmem:[%s2699_s9 + $0xe0] sm:$0xff] }
  0xba   : > { %v1817_v3 = vadd.f32 %v2737_v40, %v1109_v63  ;;  %v1849_v4 = vadd.f32 %v2737_v40, %v1189_v0  ;;  %v2543_v63 = vld [vmem:[%s2699_s9 + $0x1e0] sm:$0xff] }
  0xbb   : > { %2008 = vst [vmem:[%s2744_s18 + $0x208] sm:$0xff] %v1880_v61 }
  0xbc   : > { %2040 = vst [vmem:[%s2744_s18 + $0x308] sm:$0xff] %v1912_v62  ;;  %1148 = vmatmul.bf16.gmra.mxu0 %v2492_v59  ;;  %1228 = vmatmul.bf16.gmra.mxu1 %v2508_v60  ;;  %v2527_v62 = vld [vmem:[%s2699_s9 + $0x160] sm:$0xff] }
  0xbd   : > { %1945 = vst [vmem:[%s2744_s18 + $0x10] sm:$0xff] %v1817_v3  ;;  %1308 = vmatmul.bf16.gmra.mxu2 %v2524_v1  ;;  %1388 = vmatmul.bf16.gmra.mxu3 %v2540_v2 }
  0xbe   : > { %1977 = vst [vmem:[%s2744_s18 + $0x110] sm:$0xff] %v1849_v4 }
  0xc0   : > { %v1269_v5 = vpop.f32.mrf.mxu2  ;;  %v1349_v6 = vpop.f32.mrf.mxu3 }
  0xc1   : > { %v1881_v7 = vadd.f32 %v2737_v40, %v1269_v5  ;;  %v1913_v8 = vadd.f32 %v2737_v40, %v1349_v6  ;;  %v1111_v9 = vpop.f32.mrf.mxu0  ;;  %v1191_v10 = vpop.f32.mrf.mxu1 }
  0xc2   : > { %v1818_v11 = vadd.f32 %v2737_v40, %v1111_v9  ;;  %v1850_v12 = vadd.f32 %v2737_v40, %v1191_v10 }
  0xc3   : > { %2009 = vst [vmem:[%s2744_s18 + $0x210] sm:$0xff] %v1881_v7 }
  0xc4   : > { %2041 = vst [vmem:[%s2744_s18 + $0x310] sm:$0xff] %v1913_v8 }
  0xc5   : > { %1946 = vst [vmem:[%s2744_s18 + $0x18] sm:$0xff] %v1818_v11 }
  0xc6   : > { %1978 = vst [vmem:[%s2744_s18 + $0x118] sm:$0xff] %v1850_v12  ;;  %v2496_v12 = vld [vmem:[%s2699_s9 + $0x68] sm:$0xff] }
  0xc8   : > { %v1271_v13 = vpop.f32.mrf.mxu2  ;;  %v1351_v14 = vpop.f32.mrf.mxu3 }
  0xc9   : > { %v1882_v17 = vadd.f32 %v2737_v40, %v1271_v13  ;;  %v1914_v18 = vadd.f32 %v2737_v40, %v1351_v14  ;;  %v1114_v19 = vpop.f32.mrf.mxu0  ;;  %v1194_v20 = vpop.f32.mrf.mxu1  ;;  %v2512_v13 = vld [vmem:[%s2699_s9 + $0xe8] sm:$0xff] }
  0xca   : > { %v1819_v23 = vadd.f32 %v2737_v40, %v1114_v19  ;;  %v1851_v24 = vadd.f32 %v2737_v40, %v1194_v20  ;;  %v2544_v19 = vld [vmem:[%s2699_s9 + $0x1e8] sm:$0xff] }
  0xcb   : > { %2010 = vst [vmem:[%s2744_s18 + $0x218] sm:$0xff] %v1882_v17 }
  0xcc   : > { %2042 = vst [vmem:[%s2744_s18 + $0x318] sm:$0xff] %v1914_v18  ;;  %1153 = vmatmul.bf16.gmra.mxu0 %v2493_v15  ;;  %1233 = vmatmul.bf16.gmra.mxu1 %v2509_v16  ;;  %v2528_v18 = vld [vmem:[%s2699_s9 + $0x168] sm:$0xff] }
  0xcd   : > { %1947 = vst [vmem:[%s2744_s18 + $0x20] sm:$0xff] %v1819_v23  ;;  %1313 = vmatmul.bf16.gmra.mxu2 %v2525_v21  ;;  %1393 = vmatmul.bf16.gmra.mxu3 %v2541_v22 }
  0xce   : > { %1979 = vst [vmem:[%s2744_s18 + $0x120] sm:$0xff] %v1851_v24 }
  0xd0   : > { %v1274_v25 = vpop.f32.mrf.mxu2  ;;  %v1354_v26 = vpop.f32.mrf.mxu3 }
  0xd1   : > { %v1883_v27 = vadd.f32 %v2737_v40, %v1274_v25  ;;  %v1915_v28 = vadd.f32 %v2737_v40, %v1354_v26  ;;  %v1116_v29 = vpop.f32.mrf.mxu0  ;;  %v1196_v30 = vpop.f32.mrf.mxu1 }
  0xd2   : > { %v1820_v31 = vadd.f32 %v2737_v40, %v1116_v29  ;;  %v1852_v32 = vadd.f32 %v2737_v40, %v1196_v30 }
  0xd3   : > { %2011 = vst [vmem:[%s2744_s18 + $0x220] sm:$0xff] %v1883_v27 }
  0xd4   : > { %2043 = vst [vmem:[%s2744_s18 + $0x320] sm:$0xff] %v1915_v28 }
  0xd5   : > { %1948 = vst [vmem:[%s2744_s18 + $0x28] sm:$0xff] %v1820_v31 }
  0xd6   : > { %1980 = vst [vmem:[%s2744_s18 + $0x128] sm:$0xff] %v1852_v32  ;;  %v2497_v32 = vld [vmem:[%s2699_s9 + $0x70] sm:$0xff] }
  0xd8   : > { %v1276_v33 = vpop.f32.mrf.mxu2  ;;  %v1356_v34 = vpop.f32.mrf.mxu3 }
  0xd9   : > { %v1884_v37 = vadd.f32 %v2737_v40, %v1276_v33  ;;  %v1916_v38 = vadd.f32 %v2737_v40, %v1356_v34  ;;  %v1119_v39 = vpop.f32.mrf.mxu0  ;;  %v1199_v41 = vpop.f32.mrf.mxu1  ;;  %v2513_v33 = vld [vmem:[%s2699_s9 + $0xf0] sm:$0xff] }
  0xda   : > { %v1821_v44 = vadd.f32 %v2737_v40, %v1119_v39  ;;  %v1853_v45 = vadd.f32 %v2737_v40, %v1199_v41  ;;  %v2545_v39 = vld [vmem:[%s2699_s9 + $0x1f0] sm:$0xff] }
  0xdb   : > { %2012 = vst [vmem:[%s2744_s18 + $0x228] sm:$0xff] %v1884_v37 }
  0xdc   : > { %2044 = vst [vmem:[%s2744_s18 + $0x328] sm:$0xff] %v1916_v38  ;;  %1158 = vmatmul.bf16.gmra.mxu0 %v2494_v35  ;;  %1238 = vmatmul.bf16.gmra.mxu1 %v2510_v36  ;;  %v2529_v38 = vld [vmem:[%s2699_s9 + $0x170] sm:$0xff] }
  0xdd   : > { %1949 = vst [vmem:[%s2744_s18 + $0x30] sm:$0xff] %v1821_v44  ;;  %1318 = vmatmul.bf16.gmra.mxu2 %v2526_v42  ;;  %1398 = vmatmul.bf16.gmra.mxu3 %v2542_v43 }
  0xde   : > { %1981 = vst [vmem:[%s2744_s18 + $0x130] sm:$0xff] %v1853_v45 }
  0xe0   : > { %v1279_v46 = vpop.f32.mrf.mxu2  ;;  %v1359_v47 = vpop.f32.mrf.mxu3 }
  0xe1   : > { %v1885_v48 = vadd.f32 %v2737_v40, %v1279_v46  ;;  %v1917_v49 = vadd.f32 %v2737_v40, %v1359_v47  ;;  %v1121_v50 = vpop.f32.mrf.mxu0  ;;  %v1201_v51 = vpop.f32.mrf.mxu1 }
  0xe2   : > { %v1822_v52 = vadd.f32 %v2737_v40, %v1121_v50  ;;  %v1854_v53 = vadd.f32 %v2737_v40, %v1201_v51 }
  0xe3   : > { %2013 = vst [vmem:[%s2744_s18 + $0x230] sm:$0xff] %v1885_v48 }
  0xe4   : > { %2045 = vst [vmem:[%s2744_s18 + $0x330] sm:$0xff] %v1917_v49 }
  0xe5   : > { %1950 = vst [vmem:[%s2744_s18 + $0x38] sm:$0xff] %v1822_v52 }
  0xe6   : > { %1982 = vst [vmem:[%s2744_s18 + $0x138] sm:$0xff] %v1854_v53  ;;  %v2498_v53 = vld [vmem:[%s2699_s9 + $0x78] sm:$0xff] }
  0xe8   : > { %v1281_v54 = vpop.f32.mrf.mxu2  ;;  %v1361_v55 = vpop.f32.mrf.mxu3 }
  0xe9   : > { %v1886_v58 = vadd.f32 %v2737_v40, %v1281_v54  ;;  %v1918_v59 = vadd.f32 %v2737_v40, %v1361_v55  ;;  %v1124_v60 = vpop.f32.mrf.mxu0  ;;  %v1204_v61 = vpop.f32.mrf.mxu1  ;;  %v2514_v54 = vld [vmem:[%s2699_s9 + $0xf8] sm:$0xff] }
  0xea   : > { %v1823_v0 = vadd.f32 %v2737_v40, %v1124_v60  ;;  %v1855_v1 = vadd.f32 %v2737_v40, %v1204_v61  ;;  %v2546_v60 = vld [vmem:[%s2699_s9 + $0x1f8] sm:$0xff] }
  0xeb   : > { %2014 = vst [vmem:[%s2744_s18 + $0x238] sm:$0xff] %v1886_v58 }
  0xec   : > { %2046 = vst [vmem:[%s2744_s18 + $0x338] sm:$0xff] %v1918_v59  ;;  %1163 = vmatmul.bf16.gmra.mxu0 %v2495_v56  ;;  %1243 = vmatmul.bf16.gmra.mxu1 %v2511_v57  ;;  %v2530_v59 = vld [vmem:[%s2699_s9 + $0x178] sm:$0xff] }
  0xed   : > { %1951 = vst [vmem:[%s2744_s18 + $0x40] sm:$0xff] %v1823_v0  ;;  %1323 = vmatmul.bf16.gmra.mxu2 %v2527_v62  ;;  %1403 = vmatmul.bf16.gmra.mxu3 %v2543_v63 }
  0xee   : > { %1983 = vst [vmem:[%s2744_s18 + $0x140] sm:$0xff] %v1855_v1 }
  0xf0   : > { %v1284_v2 = vpop.f32.mrf.mxu2  ;;  %v1364_v3 = vpop.f32.mrf.mxu3 }
  0xf1   : > { %v1887_v4 = vadd.f32 %v2737_v40, %v1284_v2  ;;  %v1919_v5 = vadd.f32 %v2737_v40, %v1364_v3  ;;  %v1126_v6 = vpop.f32.mrf.mxu0  ;;  %v1206_v7 = vpop.f32.mrf.mxu1 }
  0xf2   : > { %v1824_v8 = vadd.f32 %v2737_v40, %v1126_v6  ;;  %v1856_v9 = vadd.f32 %v2737_v40, %v1206_v7 }
  0xf3   : > { %2015 = vst [vmem:[%s2744_s18 + $0x240] sm:$0xff] %v1887_v4 }
  0xf4   : > { %2047 = vst [vmem:[%s2744_s18 + $0x340] sm:$0xff] %v1919_v5 }
  0xf5   : > { %1952 = vst [vmem:[%s2744_s18 + $0x48] sm:$0xff] %v1824_v8 }
  0xf6   : > { %1984 = vst [vmem:[%s2744_s18 + $0x148] sm:$0xff] %v1856_v9 }
  0xf8   : > { %v1286_v10 = vpop.f32.mrf.mxu2  ;;  %v1366_v11 = vpop.f32.mrf.mxu3 }
  0xf9   : > { %v1888_v14 = vadd.f32 %v2737_v40, %v1286_v10  ;;  %v1920_v15 = vadd.f32 %v2737_v40, %v1366_v11  ;;  %v1129_v16 = vpop.f32.mrf.mxu0  ;;  %v1209_v17 = vpop.f32.mrf.mxu1 }
  0xfa   : > { %v1825_v20 = vadd.f32 %v2737_v40, %v1129_v16  ;;  %v1857_v21 = vadd.f32 %v2737_v40, %v1209_v17 }
  0xfb   : > { %2016 = vst [vmem:[%s2744_s18 + $0x248] sm:$0xff] %v1888_v14 }
  0xfc   : > { %2048 = vst [vmem:[%s2744_s18 + $0x348] sm:$0xff] %v1920_v15  ;;  %1168 = vmatmul.bf16.gmra.mxu0 %v2496_v12  ;;  %1248 = vmatmul.bf16.gmra.mxu1 %v2512_v13 }
  0xfd   : > { %1953 = vst [vmem:[%s2744_s18 + $0x50] sm:$0xff] %v1825_v20  ;;  %1328 = vmatmul.bf16.gmra.mxu2 %v2528_v18  ;;  %1408 = vmatmul.bf16.gmra.mxu3 %v2544_v19 }
  0xfe   : > { %1985 = vst [vmem:[%s2744_s18 + $0x150] sm:$0xff] %v1857_v21 }
 0x100   : > { %v1289_v22 = vpop.f32.mrf.mxu2  ;;  %v1369_v23 = vpop.f32.mrf.mxu3 }
 0x101   : > { %v1889_v24 = vadd.f32 %v2737_v40, %v1289_v22  ;;  %v1921_v25 = vadd.f32 %v2737_v40, %v1369_v23  ;;  %v1131_v26 = vpop.f32.mrf.mxu0  ;;  %v1211_v27 = vpop.f32.mrf.mxu1 }
 0x102   : > { %v1826_v28 = vadd.f32 %v2737_v40, %v1131_v26  ;;  %v1858_v29 = vadd.f32 %v2737_v40, %v1211_v27 }
 0x103   : > { %2017 = vst [vmem:[%s2744_s18 + $0x250] sm:$0xff] %v1889_v24 }
 0x104   : > { %2049 = vst [vmem:[%s2744_s18 + $0x350] sm:$0xff] %v1921_v25 }
 0x105   : > { %1954 = vst [vmem:[%s2744_s18 + $0x58] sm:$0xff] %v1826_v28 }
 0x106   : > { %1986 = vst [vmem:[%s2744_s18 + $0x158] sm:$0xff] %v1858_v29 }
 0x108   : > { %v1291_v30 = vpop.f32.mrf.mxu2  ;;  %v1371_v31 = vpop.f32.mrf.mxu3 }
 0x109   : > { %v1890_v34 = vadd.f32 %v2737_v40, %v1291_v30  ;;  %v1922_v35 = vadd.f32 %v2737_v40, %v1371_v31  ;;  %v1134_v36 = vpop.f32.mrf.mxu0  ;;  %v1214_v37 = vpop.f32.mrf.mxu1 }
 0x10a   : > { %v1827_v41 = vadd.f32 %v2737_v40, %v1134_v36  ;;  %v1859_v42 = vadd.f32 %v2737_v40, %v1214_v37 }
 0x10b   : > { %2018 = vst [vmem:[%s2744_s18 + $0x258] sm:$0xff] %v1890_v34 }
 0x10c   : > { %2050 = vst [vmem:[%s2744_s18 + $0x358] sm:$0xff] %v1922_v35  ;;  %1173 = vmatmul.bf16.gmra.mxu0 %v2497_v32  ;;  %1253 = vmatmul.bf16.gmra.mxu1 %v2513_v33 }
 0x10d   : > { %1955 = vst [vmem:[%s2744_s18 + $0x60] sm:$0xff] %v1827_v41  ;;  %1333 = vmatmul.bf16.gmra.mxu2 %v2529_v38  ;;  %1413 = vmatmul.bf16.gmra.mxu3 %v2545_v39 }
 0x10e   : > { %1987 = vst [vmem:[%s2744_s18 + $0x160] sm:$0xff] %v1859_v42 }
 0x110   : > { %v1294_v43 = vpop.f32.mrf.mxu2  ;;  %v1374_v44 = vpop.f32.mrf.mxu3 }
 0x111   : > { %v1891_v45 = vadd.f32 %v2737_v40, %v1294_v43  ;;  %v1923_v46 = vadd.f32 %v2737_v40, %v1374_v44  ;;  %v1136_v47 = vpop.f32.mrf.mxu0  ;;  %v1216_v48 = vpop.f32.mrf.mxu1 }
 0x112   : > { %v1828_v49 = vadd.f32 %v2737_v40, %v1136_v47  ;;  %v1860_v50 = vadd.f32 %v2737_v40, %v1216_v48 }
 0x113   : > { %2019 = vst [vmem:[%s2744_s18 + $0x260] sm:$0xff] %v1891_v45 }
 0x114   : > { %2051 = vst [vmem:[%s2744_s18 + $0x360] sm:$0xff] %v1923_v46 }
 0x115   : > { %1956 = vst [vmem:[%s2744_s18 + $0x68] sm:$0xff] %v1828_v49 }
 0x116   : > { %1988 = vst [vmem:[%s2744_s18 + $0x168] sm:$0xff] %v1860_v50 }
 0x118   : > { %v1296_v51 = vpop.f32.mrf.mxu2  ;;  %v1376_v52 = vpop.f32.mrf.mxu3 }
 0x119   : > { %v1892_v55 = vadd.f32 %v2737_v40, %v1296_v51  ;;  %v1924_v56 = vadd.f32 %v2737_v40, %v1376_v52  ;;  %v1139_v57 = vpop.f32.mrf.mxu0  ;;  %v1219_v58 = vpop.f32.mrf.mxu1 }
 0x11a   : > { %v1829_v61 = vadd.f32 %v2737_v40, %v1139_v57  ;;  %v1861_v62 = vadd.f32 %v2737_v40, %v1219_v58 }
 0x11b   : > { %2020 = vst [vmem:[%s2744_s18 + $0x268] sm:$0xff] %v1892_v55 }
 0x11c   : > { %2052 = vst [vmem:[%s2744_s18 + $0x368] sm:$0xff] %v1924_v56  ;;  %1178 = vmatmul.bf16.gmra.mxu0 %v2498_v53  ;;  %1258 = vmatmul.bf16.gmra.mxu1 %v2514_v54 }
 0x11d   : > { %1957 = vst [vmem:[%s2744_s18 + $0x70] sm:$0xff] %v1829_v61  ;;  %1338 = vmatmul.bf16.gmra.mxu2 %v2530_v59  ;;  %1418 = vmatmul.bf16.gmra.mxu3 %v2546_v60 }
 0x11e   : > { %1989 = vst [vmem:[%s2744_s18 + $0x170] sm:$0xff] %v1861_v62 }
 0x120   : > { %v1299_v63 = vpop.f32.mrf.mxu2  ;;  %v1379_v0 = vpop.f32.mrf.mxu3 }
 0x121   : > { %v1893_v1 = vadd.f32 %v2737_v40, %v1299_v63  ;;  %v1925_v2 = vadd.f32 %v2737_v40, %v1379_v0  ;;  %v1141_v3 = vpop.f32.mrf.mxu0  ;;  %v1221_v4 = vpop.f32.mrf.mxu1 }
 0x122   : > { %v1830_v5 = vadd.f32 %v2737_v40, %v1141_v3  ;;  %v1862_v6 = vadd.f32 %v2737_v40, %v1221_v4 }
 0x123   : > { %2021 = vst [vmem:[%s2744_s18 + $0x270] sm:$0xff] %v1893_v1 }
 0x124   : > { %2053 = vst [vmem:[%s2744_s18 + $0x370] sm:$0xff] %v1925_v2 }
 0x125   : > { %1958 = vst [vmem:[%s2744_s18 + $0x78] sm:$0xff] %v1830_v5 }
 0x126   : > { %1990 = vst [vmem:[%s2744_s18 + $0x178] sm:$0xff] %v1862_v6 }
 0x128   : > { %v1301_v7 = vpop.f32.mrf.mxu2  ;;  %v1381_v8 = vpop.f32.mrf.mxu3 }
 0x129   : > { %v1894_v9 = vadd.f32 %v2737_v40, %v1301_v7  ;;  %v1926_v10 = vadd.f32 %v2737_v40, %v1381_v8  ;;  %v1144_v11 = vpop.f32.mrf.mxu0  ;;  %v1224_v12 = vpop.f32.mrf.mxu1 }
 0x12a   : > { %v1831_v13 = vadd.f32 %v2737_v40, %v1144_v11  ;;  %v1863_v14 = vadd.f32 %v2737_v40, %v1224_v12 }
 0x12b   : > { %2022 = vst [vmem:[%s2744_s18 + $0x278] sm:$0xff] %v1894_v9 }
 0x12c   : > { %2054 = vst [vmem:[%s2744_s18 + $0x378] sm:$0xff] %v1926_v10 }
 0x12d   : > { %1959 = vst [vmem:[%s2744_s18 + $0x80] sm:$0xff] %v1831_v13 }
 0x12e   : > { %1991 = vst [vmem:[%s2744_s18 + $0x180] sm:$0xff] %v1863_v14 }
 0x130   : > { %v1304_v15 = vpop.f32.mrf.mxu2  ;;  %v1384_v16 = vpop.f32.mrf.mxu3 }
 0x131   : > { %v1895_v17 = vadd.f32 %v2737_v40, %v1304_v15  ;;  %v1927_v18 = vadd.f32 %v2737_v40, %v1384_v16  ;;  %v1146_v19 = vpop.f32.mrf.mxu0  ;;  %v1226_v20 = vpop.f32.mrf.mxu1 }
 0x132   : > { %v1832_v21 = vadd.f32 %v2737_v40, %v1146_v19  ;;  %v1864_v22 = vadd.f32 %v2737_v40, %v1226_v20 }
 0x133   : > { %2023 = vst [vmem:[%s2744_s18 + $0x280] sm:$0xff] %v1895_v17 }
 0x134   : > { %2055 = vst [vmem:[%s2744_s18 + $0x380] sm:$0xff] %v1927_v18 }
 0x135   : > { %1960 = vst [vmem:[%s2744_s18 + $0x88] sm:$0xff] %v1832_v21 }
 0x136   : > { %1992 = vst [vmem:[%s2744_s18 + $0x188] sm:$0xff] %v1864_v22 }
 0x138   : > { %v1306_v23 = vpop.f32.mrf.mxu2  ;;  %v1386_v24 = vpop.f32.mrf.mxu3 }
 0x139   : > { %v1896_v25 = vadd.f32 %v2737_v40, %v1306_v23  ;;  %v1928_v26 = vadd.f32 %v2737_v40, %v1386_v24  ;;  %v1149_v27 = vpop.f32.mrf.mxu0  ;;  %v1229_v28 = vpop.f32.mrf.mxu1 }
 0x13a   : > { %v1833_v29 = vadd.f32 %v2737_v40, %v1149_v27  ;;  %v1865_v30 = vadd.f32 %v2737_v40, %v1229_v28 }
 0x13b   : > { %2024 = vst [vmem:[%s2744_s18 + $0x288] sm:$0xff] %v1896_v25 }
 0x13c   : > { %2056 = vst [vmem:[%s2744_s18 + $0x388] sm:$0xff] %v1928_v26 }
 0x13d   : > { %1961 = vst [vmem:[%s2744_s18 + $0x90] sm:$0xff] %v1833_v29 }
 0x13e   : > { %1993 = vst [vmem:[%s2744_s18 + $0x190] sm:$0xff] %v1865_v30 }
 0x140   : > { %v1309_v31 = vpop.f32.mrf.mxu2  ;;  %v1389_v32 = vpop.f32.mrf.mxu3 }
 0x141   : > { %v1897_v33 = vadd.f32 %v2737_v40, %v1309_v31  ;;  %v1929_v34 = vadd.f32 %v2737_v40, %v1389_v32  ;;  %v1151_v35 = vpop.f32.mrf.mxu0  ;;  %v1231_v36 = vpop.f32.mrf.mxu1 }
 0x142   : > { %v1834_v37 = vadd.f32 %v2737_v40, %v1151_v35  ;;  %v1866_v38 = vadd.f32 %v2737_v40, %v1231_v36 }
 0x143   : > { %2025 = vst [vmem:[%s2744_s18 + $0x290] sm:$0xff] %v1897_v33 }
 0x144   : > { %2057 = vst [vmem:[%s2744_s18 + $0x390] sm:$0xff] %v1929_v34 }
 0x145   : > { %1962 = vst [vmem:[%s2744_s18 + $0x98] sm:$0xff] %v1834_v37 }
 0x146   : > { %1994 = vst [vmem:[%s2744_s18 + $0x198] sm:$0xff] %v1866_v38 }
 0x148   : > { %v1311_v39 = vpop.f32.mrf.mxu2  ;;  %v1391_v41 = vpop.f32.mrf.mxu3 }
 0x149   : > { %v1898_v42 = vadd.f32 %v2737_v40, %v1311_v39  ;;  %v1930_v43 = vadd.f32 %v2737_v40, %v1391_v41  ;;  %v1154_v44 = vpop.f32.mrf.mxu0  ;;  %v1234_v45 = vpop.f32.mrf.mxu1 }
 0x14a   : > { %v1835_v46 = vadd.f32 %v2737_v40, %v1154_v44  ;;  %v1867_v47 = vadd.f32 %v2737_v40, %v1234_v45 }
 0x14b   : > { %2026 = vst [vmem:[%s2744_s18 + $0x298] sm:$0xff] %v1898_v42 }
 0x14c   : > { %2058 = vst [vmem:[%s2744_s18 + $0x398] sm:$0xff] %v1930_v43 }
 0x14d   : > { %1963 = vst [vmem:[%s2744_s18 + $0xa0] sm:$0xff] %v1835_v46 }
 0x14e   : > { %1995 = vst [vmem:[%s2744_s18 + $0x1a0] sm:$0xff] %v1867_v47 }
 0x150   : > { %v1314_v48 = vpop.f32.mrf.mxu2  ;;  %v1394_v49 = vpop.f32.mrf.mxu3 }
 0x151   : > { %v1899_v50 = vadd.f32 %v2737_v40, %v1314_v48  ;;  %v1931_v51 = vadd.f32 %v2737_v40, %v1394_v49  ;;  %v1156_v52 = vpop.f32.mrf.mxu0  ;;  %v1236_v53 = vpop.f32.mrf.mxu1 }
 0x152   : > { %v1836_v54 = vadd.f32 %v2737_v40, %v1156_v52  ;;  %v1868_v55 = vadd.f32 %v2737_v40, %v1236_v53 }
 0x153   : > { %2027 = vst [vmem:[%s2744_s18 + $0x2a0] sm:$0xff] %v1899_v50 }
 0x154   : > { %2059 = vst [vmem:[%s2744_s18 + $0x3a0] sm:$0xff] %v1931_v51 }
 0x155   : > { %1964 = vst [vmem:[%s2744_s18 + $0xa8] sm:$0xff] %v1836_v54 }
 0x156   : > { %1996 = vst [vmem:[%s2744_s18 + $0x1a8] sm:$0xff] %v1868_v55 }
 0x158   : > { %v1316_v56 = vpop.f32.mrf.mxu2  ;;  %v1396_v57 = vpop.f32.mrf.mxu3 }
 0x159   : > { %v1900_v58 = vadd.f32 %v2737_v40, %v1316_v56  ;;  %v1932_v59 = vadd.f32 %v2737_v40, %v1396_v57  ;;  %v1159_v60 = vpop.f32.mrf.mxu0  ;;  %v1239_v61 = vpop.f32.mrf.mxu1 }
 0x15a   : > { %v1837_v62 = vadd.f32 %v2737_v40, %v1159_v60  ;;  %v1869_v63 = vadd.f32 %v2737_v40, %v1239_v61 }
 0x15b   : > { %2028 = vst [vmem:[%s2744_s18 + $0x2a8] sm:$0xff] %v1900_v58 }
 0x15c   : > { %2060 = vst [vmem:[%s2744_s18 + $0x3a8] sm:$0xff] %v1932_v59 }
 0x15d   : > { %1965 = vst [vmem:[%s2744_s18 + $0xb0] sm:$0xff] %v1837_v62 }
 0x15e   : > { %1997 = vst [vmem:[%s2744_s18 + $0x1b0] sm:$0xff] %v1869_v63 }
 0x160   : > { %v1319_v0 = vpop.f32.mrf.mxu2  ;;  %v1399_v1 = vpop.f32.mrf.mxu3 }
 0x161   : > { %v1901_v2 = vadd.f32 %v2737_v40, %v1319_v0  ;;  %v1933_v3 = vadd.f32 %v2737_v40, %v1399_v1  ;;  %v1161_v4 = vpop.f32.mrf.mxu0  ;;  %v1241_v5 = vpop.f32.mrf.mxu1 }
 0x162   : > { %v1838_v6 = vadd.f32 %v2737_v40, %v1161_v4  ;;  %v1870_v7 = vadd.f32 %v2737_v40, %v1241_v5 }
 0x163   : > { %2029 = vst [vmem:[%s2744_s18 + $0x2b0] sm:$0xff] %v1901_v2 }
 0x164   : > { %2061 = vst [vmem:[%s2744_s18 + $0x3b0] sm:$0xff] %v1933_v3 }
 0x165   : > { %1966 = vst [vmem:[%s2744_s18 + $0xb8] sm:$0xff] %v1838_v6 }
 0x166   : > { %1998 = vst [vmem:[%s2744_s18 + $0x1b8] sm:$0xff] %v1870_v7 }
 0x168   : > { %v1321_v8 = vpop.f32.mrf.mxu2  ;;  %v1401_v9 = vpop.f32.mrf.mxu3 }
 0x169   : > { %v1902_v10 = vadd.f32 %v2737_v40, %v1321_v8  ;;  %v1934_v11 = vadd.f32 %v2737_v40, %v1401_v9  ;;  %v1164_v12 = vpop.f32.mrf.mxu0  ;;  %v1244_v13 = vpop.f32.mrf.mxu1 }
 0x16a   : > { %v1839_v14 = vadd.f32 %v2737_v40, %v1164_v12  ;;  %v1871_v15 = vadd.f32 %v2737_v40, %v1244_v13 }
 0x16b   : > { %2030 = vst [vmem:[%s2744_s18 + $0x2b8] sm:$0xff] %v1902_v10 }
 0x16c   : > { %2062 = vst [vmem:[%s2744_s18 + $0x3b8] sm:$0xff] %v1934_v11 }
 0x16d   : > { %1967 = vst [vmem:[%s2744_s18 + $0xc0] sm:$0xff] %v1839_v14 }
 0x16e   : > { %1999 = vst [vmem:[%s2744_s18 + $0x1c0] sm:$0xff] %v1871_v15 }
 0x170   : > { %v1324_v16 = vpop.f32.mrf.mxu2  ;;  %v1404_v17 = vpop.f32.mrf.mxu3 }
 0x171   : > { %v1903_v18 = vadd.f32 %v2737_v40, %v1324_v16  ;;  %v1935_v19 = vadd.f32 %v2737_v40, %v1404_v17  ;;  %v1166_v20 = vpop.f32.mrf.mxu0  ;;  %v1246_v21 = vpop.f32.mrf.mxu1 }
 0x172   : > { %v1840_v22 = vadd.f32 %v2737_v40, %v1166_v20  ;;  %v1872_v23 = vadd.f32 %v2737_v40, %v1246_v21 }
 0x173   : > { %2031 = vst [vmem:[%s2744_s18 + $0x2c0] sm:$0xff] %v1903_v18 }
 0x174   : > { %2063 = vst [vmem:[%s2744_s18 + $0x3c0] sm:$0xff] %v1935_v19 }
 0x175   : > { %1968 = vst [vmem:[%s2744_s18 + $0xc8] sm:$0xff] %v1840_v22 }
 0x176   : > { %2000 = vst [vmem:[%s2744_s18 + $0x1c8] sm:$0xff] %v1872_v23 }
 0x178   : > { %v1326_v24 = vpop.f32.mrf.mxu2  ;;  %v1406_v25 = vpop.f32.mrf.mxu3 }
 0x179   : > { %v1904_v26 = vadd.f32 %v2737_v40, %v1326_v24  ;;  %v1936_v27 = vadd.f32 %v2737_v40, %v1406_v25  ;;  %v1169_v28 = vpop.f32.mrf.mxu0  ;;  %v1249_v29 = vpop.f32.mrf.mxu1 }
 0x17a   : > { %v1841_v30 = vadd.f32 %v2737_v40, %v1169_v28  ;;  %v1873_v31 = vadd.f32 %v2737_v40, %v1249_v29 }
 0x17b   : > { %2032 = vst [vmem:[%s2744_s18 + $0x2c8] sm:$0xff] %v1904_v26 }
 0x17c   : > { %2064 = vst [vmem:[%s2744_s18 + $0x3c8] sm:$0xff] %v1936_v27 }
 0x17d   : > { %1969 = vst [vmem:[%s2744_s18 + $0xd0] sm:$0xff] %v1841_v30 }
 0x17e   : > { %2001 = vst [vmem:[%s2744_s18 + $0x1d0] sm:$0xff] %v1873_v31 }
 0x180   : > { %v1329_v32 = vpop.f32.mrf.mxu2  ;;  %v1409_v33 = vpop.f32.mrf.mxu3 }
 0x181   : > { %v1905_v34 = vadd.f32 %v2737_v40, %v1329_v32  ;;  %v1937_v35 = vadd.f32 %v2737_v40, %v1409_v33  ;;  %v1171_v36 = vpop.f32.mrf.mxu0  ;;  %v1251_v37 = vpop.f32.mrf.mxu1 }
 0x182   : > { %v1842_v38 = vadd.f32 %v2737_v40, %v1171_v36  ;;  %v1874_v39 = vadd.f32 %v2737_v40, %v1251_v37 }
 0x183   : > { %2033 = vst [vmem:[%s2744_s18 + $0x2d0] sm:$0xff] %v1905_v34 }
 0x184   : > { %2065 = vst [vmem:[%s2744_s18 + $0x3d0] sm:$0xff] %v1937_v35 }
 0x185   : > { %1970 = vst [vmem:[%s2744_s18 + $0xd8] sm:$0xff] %v1842_v38 }
 0x186   : > { %2002 = vst [vmem:[%s2744_s18 + $0x1d8] sm:$0xff] %v1874_v39 }
 0x188   : > { %v1331_v41 = vpop.f32.mrf.mxu2  ;;  %v1411_v42 = vpop.f32.mrf.mxu3 }
 0x189   : > { %v1906_v43 = vadd.f32 %v2737_v40, %v1331_v41  ;;  %v1938_v44 = vadd.f32 %v2737_v40, %v1411_v42  ;;  %v1174_v45 = vpop.f32.mrf.mxu0  ;;  %v1254_v46 = vpop.f32.mrf.mxu1 }
 0x18a   : > { %v1843_v47 = vadd.f32 %v2737_v40, %v1174_v45  ;;  %v1875_v48 = vadd.f32 %v2737_v40, %v1254_v46 }
 0x18b   : > { %2034 = vst [vmem:[%s2744_s18 + $0x2d8] sm:$0xff] %v1906_v43 }
 0x18c   : > { %2066 = vst [vmem:[%s2744_s18 + $0x3d8] sm:$0xff] %v1938_v44 }
 0x18d   : > { %1971 = vst [vmem:[%s2744_s18 + $0xe0] sm:$0xff] %v1843_v47 }
 0x18e   : > { %2003 = vst [vmem:[%s2744_s18 + $0x1e0] sm:$0xff] %v1875_v48 }
 0x190   : > { %v1334_v49 = vpop.f32.mrf.mxu2  ;;  %v1414_v50 = vpop.f32.mrf.mxu3 }
 0x191   : > { %v1907_v51 = vadd.f32 %v2737_v40, %v1334_v49  ;;  %v1939_v52 = vadd.f32 %v2737_v40, %v1414_v50  ;;  %v1176_v53 = vpop.f32.mrf.mxu0  ;;  %v1256_v54 = vpop.f32.mrf.mxu1 }
 0x192   : > { %v1844_v55 = vadd.f32 %v2737_v40, %v1176_v53  ;;  %v1876_v56 = vadd.f32 %v2737_v40, %v1256_v54 }
 0x193   : > { %2035 = vst [vmem:[%s2744_s18 + $0x2e0] sm:$0xff] %v1907_v51 }
 0x194   : > { %2067 = vst [vmem:[%s2744_s18 + $0x3e0] sm:$0xff] %v1939_v52 }
 0x195   : > { %1972 = vst [vmem:[%s2744_s18 + $0xe8] sm:$0xff] %v1844_v55 }
 0x196   : > { %2004 = vst [vmem:[%s2744_s18 + $0x1e8] sm:$0xff] %v1876_v56 }
 0x198   : > { %v1336_v57 = vpop.f32.mrf.mxu2  ;;  %v1416_v58 = vpop.f32.mrf.mxu3 }
 0x199   : > { %v1908_v59 = vadd.f32 %v2737_v40, %v1336_v57  ;;  %v1940_v60 = vadd.f32 %v2737_v40, %v1416_v58  ;;  %v1179_v61 = vpop.f32.mrf.mxu0  ;;  %v1259_v62 = vpop.f32.mrf.mxu1 }
 0x19a   : > { %v1845_v63 = vadd.f32 %v2737_v40, %v1179_v61  ;;  %v1877_v0 = vadd.f32 %v2737_v40, %v1259_v62 }
 0x19b   : > { %2036 = vst [vmem:[%s2744_s18 + $0x2e8] sm:$0xff] %v1908_v59 }
 0x19c   : > { %2068 = vst [vmem:[%s2744_s18 + $0x3e8] sm:$0xff] %v1940_v60 }
 0x19d   : > { %1973 = vst [vmem:[%s2744_s18 + $0xf0] sm:$0xff] %v1845_v63 }
 0x19e   : > { %2005 = vst [vmem:[%s2744_s18 + $0x1f0] sm:$0xff] %v1877_v0 }
 0x1a0   : > { %v1339_v1 = vpop.f32.mrf.mxu2  ;;  %v1419_v2 = vpop.f32.mrf.mxu3 }
 0x1a1   : > { %v1909_v3 = vadd.f32 %v2737_v40, %v1339_v1  ;;  %v1941_v4 = vadd.f32 %v2737_v40, %v1419_v2  ;;  %v1181_v5 = vpop.f32.mrf.mxu0  ;;  %v1261_v6 = vpop.f32.mrf.mxu1 }
 0x1a2   : > { %v1846_v7 = vadd.f32 %v2737_v40, %v1181_v5  ;;  %v1878_v8 = vadd.f32 %v2737_v40, %v1261_v6 }
 0x1a3   : > { %2037 = vst [vmem:[%s2744_s18 + $0x2f0] sm:$0xff] %v1909_v3 }
 0x1a4   : > { %2069 = vst [vmem:[%s2744_s18 + $0x3f0] sm:$0xff] %v1941_v4 }
 0x1a5   : > { %1974 = vst [vmem:[%s2744_s18 + $0xf8] sm:$0xff] %v1846_v7 }
 0x1a6   : > { %2006 = vst [vmem:[%s2744_s18 + $0x1f8] sm:$0xff] %v1878_v8 }
 0x1a8   : > { %v1341_v9 = vpop.f32.mrf.mxu2  ;;  %v1421_v10 = vpop.f32.mrf.mxu3 }
 0x1a9   : > { %v1910_v11 = vadd.f32 %v2737_v40, %v1341_v9  ;;  %v1942_v12 = vadd.f32 %v2737_v40, %v1421_v10 }
 0x1ab   : > { %2038 = vst [vmem:[%s2744_s18 + $0x2f8] sm:$0xff] %v1910_v11 }
 0x1ac   : > { %2070 = vst [vmem:[%s2744_s18 + $0x3f8] sm:$0xff] %v1942_v12 }
 0x1ad PF: > { %s13_s14 = sadd.s32 1, %s2626_s14   ;;  %s3045_s12 = smov %s2622_s13 }
 0x1ae   : > { %p10_p5 = scmp.ge.s32.totalorder %s13_s14, 18   ;;  %s3046_s13 = smov %s3048_s15 }
 0x1b0   :  { %12 = sbr.rel (!%p10_p5) target bundleno = 2 (0x2), region = 76 }

</bundles_post_ra>
